<compile_context>
chip_gen: v5e
topology: v5e:2x2
jax: 0.10.0
libtpu: 0.0.40
codegen_flags: <defaults>
</compile_context>

<pallas_src>
import functools

import jax
import jax.numpy as jnp
from jax.experimental import pallas as pl
from jax.experimental.pallas import tpu as pltpu

IGNORE_INDEX = 0
_LANE = 128


def _cdiv(a, b):
    return (a + b - 1) // b


def _round_up(a, m):
    return _cdiv(a, m) * m


def _tpu_vmem_capacity_bytes():
    try:
        return int(pltpu.get_tpu_info().vmem_capacity_bytes)
    except Exception:
        return 64 << 20  # conservative fallback (v7x per-TC VMEM)


def _num_tensorcores():
    # Only v7x presents 2 TensorCores behind one device; v5e/v6e have 1.
    try:
        kind = jax.devices()[0].device_kind.lower()
    except Exception:
        return 1
    if "v7" in kind or "7x" in kind:
        return 2
    return 1


def _ce2d_kernel(x_ref, t_ref, nll_ref, cnt_ref, *, n_pix, tile, tiles_per_core):
    """Accumulate per-pixel masked NLL and valid counts into per-core lane vectors.

    x_ref: (1, C, T) logits block (classes on sublanes, pixels on lanes)
    t_ref: (1, 1, T) int32 targets
    nll_ref/cnt_ref: (1, 1, T) float32 per-core accumulators (resident across n, j).
    """
    c = pl.program_id(0)
    n = pl.program_id(1)
    j = pl.program_id(2)

    @pl.when((n == 0) & (j == 0))
    def _():
        nll_ref[...] = jnp.zeros_like(nll_ref)
        cnt_ref[...] = jnp.zeros_like(cnt_ref)

    # Tail-tile lane mask (replaces the old wrapper-side jnp.pad). pix0 uses the
    # UNCLAMPED block index so a core's trailing (clamped, replayed) steps mask out
    # entirely and nothing is double-counted.
    pix0 = (c * tiles_per_core + j) * tile
    lane = jax.lax.broadcasted_iota(jnp.int32, (1, 1, tile), 2)
    in_range = (pix0 + lane) < n_pix                                   # (1, 1, T) bool

    # TODO(synk): for very large class counts, chunk the class axis with an online
    # max/sum (flash-style) instead of binding the whole (C, T) f32 upcast at once.
    x = x_ref[...].astype(jnp.float32)                                 # (1, C, T)
    t = t_ref[...]                                                     # (1, 1, T) int32

    # Numerically stable log-sum-exp over the class (sublane) axis.
    m = jnp.max(x, axis=1, keepdims=True)                              # (1, 1, T)
    lse = jnp.log(jnp.sum(jnp.exp(x - m), axis=1, keepdims=True))      # (1, 1, T)

    # Gather x[target] via a broadcast class-iota match ((1, C, 1) iota, no per-element
    # iota generation); no full log_softmax tile is materialized.
    # TODO(synk): out-of-range targets (other than ignore_index) silently contribute
    # only (m + lse); PyTorch would raise an error instead.
    cls = jax.lax.broadcasted_iota(jnp.int32, (1, x.shape[1], 1), 1)   # (1, C, 1)
    picked = jnp.sum(jnp.where(cls == t, x, 0.0), axis=1, keepdims=True)

    valid = in_range & (t != IGNORE_INDEX)                             # (1, 1, T) bool

    # -log_softmax(x)[target] = lse + m - x[target]. Select (not multiply) so any
    # NaN/Inf produced from garbage lanes of a partial tail block cannot leak in.
    nll_ref[...] = nll_ref[...] + jnp.where(valid, lse + m - picked, 0.0)
    cnt_ref[...] = cnt_ref[...] + jnp.where(valid, 1.0, 0.0)


@jax.jit
def cross_entropy_loss_2d(inputs, targets):
    """inputs: (N, C, H, W) float logits; targets: (N, H, W) int class ids.

    Equivalent to nn.NLLLoss(ignore_index=0, reduction='mean')(F.log_softmax(inputs, 1), targets).
    Note: if every pixel is ignore_index the result is NaN (0/0), matching PyTorch.
    TODO(synk): per-class `weight` (module default None) is not implemented.
    """
    N, C, H, W = inputs.shape
    P = H * W
    itemsize = jnp.dtype(inputs.dtype).itemsize

    n_cores = _num_tensorcores()

    # --- VMEM-budgeted pixel tile --------------------------------------------
    # dtype-aware sublane rounding: f32 -> 8 rows/vreg, bf16 -> 16, int8 -> 32.
    pack = max(1, 4 // itemsize)
    c_sub_store = _round_up(C, 8 * pack)   # stored-dtype logits rows
    c_sub_f32 = _round_up(C, 8)            # f32 temporary rows

    vmem_cap = _tpu_vmem_capacity_bytes()
    budget = min(32 << 20, vmem_cap // 3)  # per-step working-set target

    # Bytes per pixel lane: double-buffered logits + targets blocks, in-kernel f32
    # upcast/exp/select temporaries, and the double-buffered f32 accumulator outputs.
    per_lane = (2 * c_sub_store * itemsize     # logits double buffer (storage dtype)
                + 2 * 8 * 4                    # int32 targets double buffer
                + 3 * c_sub_f32 * 4            # f32 temporaries
                + 2 * 2 * 8 * 4)               # nll/cnt f32 accumulators
    tile_budget = max(_LANE, (budget // per_lane) // _LANE * _LANE)
    tile_need = _round_up(_cdiv(P, n_cores), _LANE)   # per-core pixel range
    tile = max(_LANE, min(tile_need, tile_budget))

    J = _cdiv(_cdiv(P, n_cores), tile)   # pixel tiles per core
    Jt = _cdiv(P, tile)                  # valid pixel blocks in the (unpadded) array

    footprint = per_lane * tile
    vmem_limit = int(min(vmem_cap * 9 // 10, max(2 * footprint, 32 << 20)))

    # --- layout: free contiguous reshapes, NO transpose, NO pad ---------------
    x3 = inputs.reshape(N, C, P)                     # keep original dtype through DMA
    t3 = targets.reshape(N, 1, P).astype(jnp.int32)

    kernel = functools.partial(_ce2d_kernel, n_pix=P, tile=tile, tiles_per_core=J)

    def pix_block(c, n, j):
        # Clamp to the last valid block so a core's trailing (fully out-of-range)
        # steps still issue an in-bounds DMA; the kernel's lane mask zeroes them.
        return (n, 0, jnp.minimum(c * J + j, Jt - 1))

    nll_p, cnt_p = pl.pallas_call(
        kernel,
        out_shape=(
            jax.ShapeDtypeStruct((n_cores, 1, tile), jnp.float32),
            jax.ShapeDtypeStruct((n_cores, 1, tile), jnp.float32),
        ),
        grid_spec=pltpu.PrefetchScalarGridSpec(
            num_scalar_prefetch=0,
            grid=(n_cores, N, J),
            in_specs=[
                pl.BlockSpec((1, C, tile), pix_block),
                pl.BlockSpec((1, 1, tile), pix_block),
            ],
            out_specs=[
                pl.BlockSpec((1, 1, tile), lambda c, n, j: (c, 0, 0)),
                pl.BlockSpec((1, 1, tile), lambda c, n, j: (c, 0, 0)),
            ],
        ),
        compiler_params=pltpu.CompilerParams(
            dimension_semantics=("parallel", "arbitrary", "arbitrary"),
            vmem_limit_bytes=vmem_limit,
        ),
        cost_estimate=pl.CostEstimate(
            flops=int(6 * N * C * P),
            transcendentals=int(N * (C + 1) * P),
            bytes_accessed=int(N * C * P * itemsize + N * P * 4
                               + 2 * n_cores * tile * 4),
        ),
    )(x3, t3)

    # Tiny final reduction (2 * n_cores * tile elements) + mean in plain JAX.
    loss_sum = jnp.sum(nll_p, dtype=jnp.float32)
    valid_cnt = jnp.sum(cnt_p, dtype=jnp.float32)
    return (loss_sum / valid_cnt).astype(inputs.dtype)


def _reference(inputs, targets):
    # Pure-JAX reference of the PyTorch semantics, for a sanity check.
    logp = jax.nn.log_softmax(inputs.astype(jnp.float32), axis=1)          # (N, C, H, W)
    t = targets.astype(jnp.int32)
    picked = jnp.take_along_axis(logp, t[:, None, :, :], axis=1)[:, 0]     # (N, H, W)
    valid = (t != IGNORE_INDEX).astype(jnp.float32)
    return jnp.sum(-picked * valid) / jnp.sum(valid)


if __name__ == "__main__":
    key = jax.random.PRNGKey(0)
    k1, k2 = jax.random.split(key)

    N, C, H, W = 2, 4, 16, 16
    inputs = jax.random.normal(k1, (N, C, H, W), dtype=jnp.float32)
    targets = jax.random.randint(k2, (N, H, W), 0, C, dtype=jnp.int32)

    loss = cross_entropy_loss_2d(inputs, targets)
    jax.block_until_ready(loss)

    ref = _reference(inputs, targets)
    assert jnp.allclose(loss, ref, atol=1e-5, rtol=1e-5), (loss, ref)

    print("KERNEL_OK")
</pallas_src>

<mosaic_0001>
module attributes {stable_mosaic.version = 11 : i64} {
  func.func @_ce2d_kernel(%arg0: i32, %arg1: i32, %arg2: i32, %arg3: memref<1x4x256xf32, #tpu.memory_space<vmem>>, %arg4: memref<1x1x256xi32, #tpu.memory_space<vmem>>, %arg5: memref<1x1x256xf32, #tpu.memory_space<vmem>>, %arg6: memref<1x1x256xf32, #tpu.memory_space<vmem>>) attributes {dimension_semantics = [#tpu.dimension_semantics<parallel>, #tpu.dimension_semantics<arbitrary>, #tpu.dimension_semantics<arbitrary>], iteration_bounds = array<i64: 1, 2, 1>, scalar_prefetch = 0 : i64, scratch_operands = 0 : i64, tpu.core_type = #tpu.core_type<tc>, window_params = [{transform_indices = @transform_0, window_bounds = array<i64: 1, 4, 256>}, {transform_indices = @transform_1, window_bounds = array<i64: 1, 1, 256>}, {transform_indices = @transform_2, window_bounds = array<i64: 1, 1, 256>}, {transform_indices = @transform_3, window_bounds = array<i64: 1, 1, 256>}]} {
    %c0_i32 = arith.constant 0 : i32
    %0 = arith.cmpi eq, %arg1, %c0_i32 : i32
    %c0_i32_0 = arith.constant 0 : i32
    %1 = arith.cmpi eq, %arg2, %c0_i32_0 : i32
    %2 = arith.andi %0, %1 : i1
    %3 = arith.extui %2 : i1 to i32
    %c0_i32_1 = arith.constant 0 : i32
    %4 = arith.cmpi ne, %3, %c0_i32_1 : i32
    scf.if %4 {
      %cst_27 = arith.constant 0.000000e+00 : f32
      %47 = vector.broadcast %cst_27 : f32 to vector<1x1x256xf32>
      %c0_28 = arith.constant 0 : index
      %c0_29 = arith.constant 0 : index
      %c0_30 = arith.constant 0 : index
      %48 = vector.load %arg5[%c0_28, %c0_29, %c0_30] : memref<1x1x256xf32, #tpu.memory_space<vmem>>, vector<1x1x256xf32>
      tpu.vector_store %arg5[%c0_28, %c0_29, %c0_30], %47 {strides = array<i32>} : memref<1x1x256xf32, #tpu.memory_space<vmem>>, vector<1x1x256xf32>,
      %cst_31 = arith.constant 0.000000e+00 : f32
      %49 = vector.broadcast %cst_31 : f32 to vector<1x1x256xf32>
      %c0_32 = arith.constant 0 : index
      %c0_33 = arith.constant 0 : index
      %c0_34 = arith.constant 0 : index
      %50 = vector.load %arg6[%c0_32, %c0_33, %c0_34] : memref<1x1x256xf32, #tpu.memory_space<vmem>>, vector<1x1x256xf32>
      tpu.vector_store %arg6[%c0_32, %c0_33, %c0_34], %49 {strides = array<i32>} : memref<1x1x256xf32, #tpu.memory_space<vmem>>, vector<1x1x256xf32>,
    } else {
    }
    %c1_i32 = arith.constant 1 : i32
    %5 = arith.muli %arg0, %c1_i32 : i32
    %6 = arith.addi %5, %arg2 : i32
    %c256_i32 = arith.constant 256 : i32
    %7 = arith.muli %6, %c256_i32 : i32
    %8 = tpu.iota {dimensions = array<i32: 2>} : vector<1x1x256xi32>
    %9 = vector.broadcast %7 : i32 to vector<1x1x256xi32>
    %10 = arith.addi %9, %8 : vector<1x1x256xi32>
    %c256_i32_2 = arith.constant 256 : i32
    %11 = vector.broadcast %c256_i32_2 : i32 to vector<1x1x256xi32>
    %12 = arith.cmpi slt, %10, %11 : vector<1x1x256xi32>
    %c0 = arith.constant 0 : index
    %c0_3 = arith.constant 0 : index
    %c0_4 = arith.constant 0 : index
    %13 = vector.load %arg3[%c0, %c0_3, %c0_4] : memref<1x4x256xf32, #tpu.memory_space<vmem>>, vector<1x4x256xf32>
    %c0_5 = arith.constant 0 : index
    %c0_6 = arith.constant 0 : index
    %c0_7 = arith.constant 0 : index
    %14 = vector.load %arg4[%c0_5, %c0_6, %c0_7] : memref<1x1x256xi32, #tpu.memory_space<vmem>>, vector<1x1x256xi32>
    %cst = arith.constant dense<0xFF800000> : vector<1x256xf32>
    %15 = vector.multi_reduction <maximumf>, %13, %cst [1] : vector<1x4x256xf32> to vector<1x256xf32>
    %16 = vector.shape_cast %15 : vector<1x256xf32> to vector<1x1x256xf32>
    %17 = vector.broadcast %16 : vector<1x1x256xf32> to vector<1x4x256xf32>
    %18 = arith.subf %13, %17 : vector<1x4x256xf32>
    %19 = math.exp %18 : vector<1x4x256xf32>
    %cst_8 = arith.constant dense<0.000000e+00> : vector<1x256xf32>
    %20 = vector.multi_reduction <add>, %19, %cst_8 [1] : vector<1x4x256xf32> to vector<1x256xf32>
    %21 = vector.shape_cast %20 : vector<1x256xf32> to vector<1x1x256xf32>
    %22 = math.log %21 : vector<1x1x256xf32>
    %23 = tpu.iota {dimensions = array<i32: 1>} : vector<1x4x1xi32>
    %24 = vector.broadcast %23 : vector<1x4x1xi32> to vector<1x4x256xi32>
    %25 = vector.broadcast %14 : vector<1x1x256xi32> to vector<1x4x256xi32>
    %26 = arith.cmpi eq, %24, %25 : vector<1x4x256xi32>
    %cst_9 = arith.constant 0.000000e+00 : f32
    %27 = vector.broadcast %cst_9 : f32 to vector<1x4x256xf32>
    %28 = arith.select %26, %13, %27 : vector<1x4x256xi1>, vector<1x4x256xf32>
    %cst_10 = arith.constant dense<0.000000e+00> : vector<1x256xf32>
    %29 = vector.multi_reduction <add>, %28, %cst_10 [1] : vector<1x4x256xf32> to vector<1x256xf32>
    %30 = vector.shape_cast %29 : vector<1x256xf32> to vector<1x1x256xf32>
    %c0_i32_11 = arith.constant 0 : i32
    %31 = vector.broadcast %c0_i32_11 : i32 to vector<1x1x256xi32>
    %32 = arith.cmpi ne, %14, %31 : vector<1x1x256xi32>
    %33 = arith.andi %12, %32 : vector<1x1x256xi1>
    %c0_12 = arith.constant 0 : index
    %c0_13 = arith.constant 0 : index
    %c0_14 = arith.constant 0 : index
    %34 = vector.load %arg5[%c0_12, %c0_13, %c0_14] : memref<1x1x256xf32, #tpu.memory_space<vmem>>, vector<1x1x256xf32>
    %35 = arith.addf %22, %16 : vector<1x1x256xf32>
    %36 = arith.subf %35, %30 : vector<1x1x256xf32>
    %cst_15 = arith.constant 0.000000e+00 : f32
    %37 = vector.broadcast %cst_15 : f32 to vector<1x1x256xf32>
    %38 = arith.select %33, %36, %37 : vector<1x1x256xi1>, vector<1x1x256xf32>
    %39 = arith.addf %34, %38 : vector<1x1x256xf32>
    %c0_16 = arith.constant 0 : index
    %c0_17 = arith.constant 0 : index
    %c0_18 = arith.constant 0 : index
    %40 = vector.load %arg5[%c0_16, %c0_17, %c0_18] : memref<1x1x256xf32, #tpu.memory_space<vmem>>, vector<1x1x256xf32>
    tpu.vector_store %arg5[%c0_16, %c0_17, %c0_18], %39 {strides = array<i32>} : memref<1x1x256xf32, #tpu.memory_space<vmem>>, vector<1x1x256xf32>,
    %c0_19 = arith.constant 0 : index
    %c0_20 = arith.constant 0 : index
    %c0_21 = arith.constant 0 : index
    %41 = vector.load %arg6[%c0_19, %c0_20, %c0_21] : memref<1x1x256xf32, #tpu.memory_space<vmem>>, vector<1x1x256xf32>
    %cst_22 = arith.constant 1.000000e+00 : f32
    %cst_23 = arith.constant 0.000000e+00 : f32
    %42 = vector.broadcast %cst_22 : f32 to vector<1x1x256xf32>
    %43 = vector.broadcast %cst_23 : f32 to vector<1x1x256xf32>
    %44 = arith.select %33, %42, %43 : vector<1x1x256xi1>, vector<1x1x256xf32>
    %45 = arith.addf %41, %44 : vector<1x1x256xf32>
    %c0_24 = arith.constant 0 : index
    %c0_25 = arith.constant 0 : index
    %c0_26 = arith.constant 0 : index
    %46 = vector.load %arg6[%c0_24, %c0_25, %c0_26] : memref<1x1x256xf32, #tpu.memory_space<vmem>>, vector<1x1x256xf32>
    tpu.vector_store %arg6[%c0_24, %c0_25, %c0_26], %45 {strides = array<i32>} : memref<1x1x256xf32, #tpu.memory_space<vmem>>, vector<1x1x256xf32>,
    return
  }
  func.func @transform_0(%arg0: i32, %arg1: i32, %arg2: i32) -> (i32, i32, i32) {
    %c1_i32 = arith.constant 1 : i32
    %0 = arith.muli %arg0, %c1_i32 : i32
    %1 = arith.addi %0, %arg2 : i32
    %c0_i32 = arith.constant 0 : i32
    %2 = arith.minsi %1, %c0_i32 : i32
    %c0_i32_0 = arith.constant 0 : i32
    %c0_i32_1 = arith.constant 0 : i32
    return %arg1, %c0_i32_0, %2 : i32, i32, i32
  }
  func.func @transform_1(%arg0: i32, %arg1: i32, %arg2: i32) -> (i32, i32, i32) {
    %c1_i32 = arith.constant 1 : i32
    %0 = arith.muli %arg0, %c1_i32 : i32
    %1 = arith.addi %0, %arg2 : i32
    %c0_i32 = arith.constant 0 : i32
    %2 = arith.minsi %1, %c0_i32 : i32
    %c0_i32_0 = arith.constant 0 : i32
    %c0_i32_1 = arith.constant 0 : i32
    return %arg1, %c0_i32_0, %2 : i32, i32, i32
  }
  func.func @transform_2(%arg0: i32, %arg1: i32, %arg2: i32) -> (i32, i32, i32) {
    %c0_i32 = arith.constant 0 : i32
    %c0_i32_0 = arith.constant 0 : i32
    %c0_i32_1 = arith.constant 0 : i32
    return %arg0, %c0_i32, %c0_i32_0 : i32, i32, i32
  }
  func.func @transform_3(%arg0: i32, %arg1: i32, %arg2: i32) -> (i32, i32, i32) {
    %c0_i32 = arith.constant 0 : i32
    %c0_i32_0 = arith.constant 0 : i32
    %c0_i32_1 = arith.constant 0 : i32
    return %arg0, %c0_i32, %c0_i32_0 : i32, i32, i32
  }
}

</mosaic_0001>

<bundles_post_ra>
// kernel: cross_entropy_loss_2d.1
= control target key start
LH: loop header
LB: loop body
LE: loop exit
PB: predicated region body
PF: predicated region fallthrough
CT: control target
= control target key end

     0   :  { %s636_s12 = smov 0   ;;  %s638_s13 = smov 0   ;;  %s731_s0 = inlined_call_operand.vmem [shape: f32[2,4,256], index: 0, kind: input, shape index: {}]   ;;  %s732_s1 = inlined_call_operand.vmem [shape: s32[2,1,256], index: 1, kind: input, shape index: {}]   ;;  %s733_s2 = inlined_call_operand.vmem [shape: f32[1,1,256], index: 2, kind: output, shape index: {0}]   ;;  %s734_s3 = inlined_call_operand.vmem [shape: f32[1,1,256], index: 3, kind: output, shape index: {1}]  }
   0x1   :  { %s640_s14 = smov 0  }
   0x2 LB: > { %s29_s15 = sadd.s32 1, %s607_s13  ;;  %p545_p0 = scmp.ge.s32.totalorder %s611_s14, 1  ;;  %s611_s14 = sphi %s640_s14, %s14_s14   ;;  %s607_s13 = sphi %s638_s13, %s742_s13   ;;  %s603_s12 = sphi %s636_s12, %s741_s12  }
   0x3   : > { %p31_p1 = scmp.ge.s32.totalorder %s29_s15, 2  ;;  %p206_p2 = scmp.lt.s32.totalorder %s611_s14, 3 }
   0x5   : > { %s744_s15 = smov (%p31_p1, %s29_s15), 0  ;;  %p207_p3 = pnand %p545_p0, %p206_p2 }
   0x6   : > { %p255_p4 = scmp.lt.s32.totalorder (!%p207_p3), %s603_s12, 1  ;;  %p290_p5 = scmp.eq.s32.totalorder (!%p207_p3), %s603_s12, 0 }
   0x7   : > { %210 = sbr.rel (%p207_p3) target bundleno = 94 (0x5e), region = 28 }
   0xc   : > { %s746_s12 = smov (!%p255_p4, %s603_s12), 1  ;;  %295 = sbr.rel (!%p290_p5) target bundleno = 17 (0x11), region = 32  ;;  %v296_v0 = vlaneseq (%p290_p5)  ;;  %v613_v1 = vmov (%p290_p5), 0.0  }
   0xd   : > { %s554_s16 = sshll.u32 %s746_s12, 3  ;;  %s548_s17 = sshll.u32 %s746_s12, 1 }
   0xe   : > { %s262_s20 = scalar_lea.vmem %s731_s0, %s554_s16  ;;  %s660_s23 = scalar_lea.vmem %s732_s1, %s548_s17  ;;  %vm298_vm0 = vcmp.lt.s32.totalorder (%p290_p5), %v296_v0, 256 }
   0xf   : > { %300 = vst.msk [vmem:[%s733_s2] sm:$0x3] (%p290_p5), %vm298_vm0, %v613_v1 }
  0x10   : > { %301 = vst.msk [vmem:[%s734_s3] sm:$0x3] (%p290_p5), %vm298_vm0, %v613_v1 }
  0x11 PF: > { %v312_v2 = vld [vmem:[%s262_s20] sm:$0xff]  ;;  %vm320_vm1 = vcmask 1043456   ;;  %v614_v24 = vmov 0   ;;  %vm412_vm4 = vcmask 1040384   ;;  %v615_v30 = vmov 0.0  }
  0x12   : > { %315 = vst [vmem:[#allocation1] ss:$2 sm:$0xff] %v312_v2  ;;  %v313_v23 = vld [vmem:[%s660_s23] sm:$0x3]  ;;  %v367_v32 = vlaneseq }
  0x13   : > { %vm394_vm2 = vcmp.ne.s32.totalorder %v313_v23, 0  ;;  %v369_v47 = vperm.slane %v313_v23, 0  ;;  %v370_v48 = vperm.slane %v313_v23, 1 }
  0x14   : > { %v395_v25 = vsel %vm394_vm2, 1, %v614_v24  ;;  %vm690_vm6 = vcmp.lt.s32.totalorder %v367_v32, 256  ;;  %v368_v44 = vshrl.u32 %v367_v32, 7 }
  0x15   : > { %v397_v27 = vperm.slane %v395_v25, 1  ;;  %v396_v28 = vperm.slane %v395_v25, 0 }
  0x16   : > { %vm371_vm7 = vcmp.eq.s32.totalorder %v368_v44, %v369_v47  ;;  %vm372_vm8 = vcmp.eq.s32.totalorder %v368_v44, %v370_v48  ;;  %v402_v24 = vld [vmem:[%s733_s2] sm:$0x3] }
  0x17   : > { %vm678_vm3 = vcmp.ne.s32.totalorder %v397_v27, 0  ;;  %vm684_vm5 = vcmp.ne.s32.totalorder %v396_v28, 0  ;;  %v421_v37 = vld [vmem:[%s734_s3] sm:$0x3] }
  0x18   : > { %v423_v31 = vsel %vm678_vm3, 1.0, %v615_v30  ;;  %v422_v35 = vsel %vm684_vm5, 1.0, %v615_v30 }
  0x19   : > { %v316_v3 = vld.sshfl [vmem:[#allocation1] sm:$0xff pattern:$0x75316420]  ;;  %v317_v4 = vld.sshfl [vmem:[#allocation1 + $0x8] sm:$0xff pattern:$0x75316420] }
  0x1a   : > { %v321_v5 = vsel %vm320_vm1, %v316_v3, -inf  ;;  %v328_v6 = vsel %vm320_vm1, %v317_v4, -inf  ;;  %v426_v34 = vrot.slane %v423_v31, 7 }
  0x1b   : > { %v322_v7 = vrot.slane %v321_v5, 4  ;;  %v329_v8 = vrot.slane %v328_v6, 4 }
  0x1c   : > { %v427_v38 = vsel %vm412_vm4, %v422_v35, %v426_v34 }
  0x1d   : > { %v323_v9 = vmax.f32 %v321_v5, %v322_v7  ;;  %v330_v10 = vmax.f32 %v328_v6, %v329_v8  ;;  %v429_v41 = vadd.f32 %v427_v38, %v421_v37 }
  0x1f   : > { %v324_v11 = vrot.slane %v323_v9, 2  ;;  %v331_v12 = vrot.slane %v330_v10, 2  ;;  %430 = vst.msk [vmem:[%s734_s3] sm:$0x3] %vm690_vm6, %v429_v41 }
  0x21   : > { %v325_v13 = vmax.f32 %v323_v9, %v324_v11  ;;  %v332_v14 = vmax.f32 %v330_v10, %v331_v12 }
  0x23   : > { %v326_v15 = vrot.slane %v325_v13, 1  ;;  %v333_v16 = vrot.slane %v332_v14, 1 }
  0x25   : > { %v670_v17 = vmax.f32 %v332_v14, %v333_v16  ;;  %v672_v18 = vmax.f32 %v325_v13, %v326_v15 }
  0x27   : > { %v337_v19 = vrot.slane %v670_v17, 4 }
  0x29   : > { %v338_v20 = vsel %vm320_vm1, %v672_v18, %v337_v19 }
  0x2a   : > { %v340_v21 = vsub.f32 %v312_v2, %v338_v20 }
  0x2c   : > { %v341_v22 = vmul.f32 1.442695, %v340_v21 }
  0x2e   : > { %583 = vpow2.f32 %v341_v22 }
  0x34   : > { %v584_v26 = vpop.eup %583 }
  0x35   : > { %344 = vst [vmem:[#allocation1] ss:$2 sm:$0xff] %v584_v26 }
  0x3c   : > { %v345_v39 = vld.sshfl [vmem:[#allocation1] sm:$0xff pattern:$0x75316420]  ;;  %v346_v40 = vld.sshfl [vmem:[#allocation1 + $0x8] sm:$0xff pattern:$0x75316420] }
  0x3d   : > { %v349_v42 = vsel %vm320_vm1, %v345_v39, 0.0  ;;  %v356_v43 = vsel %vm320_vm1, %v346_v40, 0.0  ;;  %373 = vst [vmem:[#allocation1] ss:$2 sm:$0xff] %v312_v2 }
  0x3e   : > { %v350_v45 = vrot.slane %v349_v42, 4  ;;  %v357_v46 = vrot.slane %v356_v43, 4 }
  0x40   : > { %v351_v49 = vadd.f32 %v350_v45, %v349_v42  ;;  %v358_v50 = vadd.f32 %v357_v46, %v356_v43 }
  0x42   : > { %v352_v51 = vrot.slane %v351_v49, 2  ;;  %v359_v52 = vrot.slane %v358_v50, 2 }
  0x44   : > { %v353_v53 = vadd.f32 %v352_v51, %v351_v49  ;;  %v360_v54 = vadd.f32 %v359_v52, %v358_v50  ;;  %v374_v55 = vld.sshfl [vmem:[#allocation1] sm:$0xff pattern:$0x75316420]  ;;  %v375_v56 = vld.sshfl [vmem:[#allocation1 + $0x8] sm:$0xff pattern:$0x75316420] }
  0x45   : > { %v378_v57 = vsel %vm371_vm7, %v374_v55, 0.0  ;;  %v379_v58 = vsel %vm372_vm8, %v375_v56, 0.0 }
  0x46   : > { %v354_v59 = vrot.slane %v353_v53, 1  ;;  %v361_v60 = vrot.slane %v360_v54, 1  ;;  %v380_v61 = vsel %vm320_vm1, %v378_v57, 0.0  ;;  %v387_v62 = vsel %vm320_vm1, %v379_v58, 0.0 }
  0x47   : > { %v381_v63 = vrot.slane %v380_v61, 4  ;;  %v388_v0 = vrot.slane %v387_v62, 4 }
  0x48   : > { %v362_v1 = vadd.f32 %v361_v60, %v360_v54  ;;  %v355_v2 = vadd.f32 %v354_v59, %v353_v53 }
  0x49   : > { %v382_v3 = vadd.f32 %v381_v63, %v380_v61  ;;  %v389_v4 = vadd.f32 %v388_v0, %v387_v62 }
  0x4a   : > { %585 = vlog2.f32 %v362_v1 }
  0x4b   : > { %587 = vlog2.f32 %v355_v2  ;;  %v383_v5 = vrot.slane %v382_v3, 2  ;;  %v390_v6 = vrot.slane %v389_v4, 2 }
  0x4d   : > { %v384_v7 = vadd.f32 %v383_v5, %v382_v3  ;;  %v391_v8 = vadd.f32 %v390_v6, %v389_v4 }
  0x4f   : > { %v392_v9 = vrot.slane %v391_v8, 1  ;;  %v385_v11 = vrot.slane %v384_v7, 1 }
  0x50   : > { %v586_v10 = vpop.eup %585 }
  0x51   : > { %v588_v12 = vpop.eup %587  ;;  %v366_v13 = vmul.f32 0.6931472, %v586_v10  ;;  %v393_v15 = vadd.f32 %v392_v9, %v391_v8  ;;  %v386_v19 = vadd.f32 %v385_v11, %v384_v7 }
  0x52   : > { %v364_v14 = vmul.f32 0.6931472, %v588_v12 }
  0x53   : > { %v404_v16 = vadd.f32 %v366_v13, %v670_v17 }
  0x54   : > { %v403_v20 = vadd.f32 %v364_v14, %v672_v18 }
  0x55   : > { %v406_v21 = vsub.f32 %v404_v16, %v393_v15 }
  0x56   : > { %v405_v22 = vsub.f32 %v403_v20, %v386_v19 }
  0x57   : > { %v408_v23 = vsel %vm678_vm3, %v406_v21, 0.0 }
  0x58   : > { %v411_v25 = vrot.slane %v408_v23, 7  ;;  %v407_v26 = vsel %vm684_vm5, %v405_v22, 0.0 }
  0x5a   : > { %v413_v27 = vsel %vm412_vm4, %v407_v26, %v411_v25 }
  0x5b   : > { %v415_v28 = vadd.f32 %v413_v27, %v402_v24 }
  0x5d   : > { %420 = vst.msk [vmem:[%s733_s2] sm:$0x3] %vm690_vm6, %v415_v28 }
  0x5e PF: > { %s14_s14 = sadd.s32 1, %s611_s14   ;;  %s741_s12 = smov %s607_s13 }
  0x5f   : > { %p11_p6 = scmp.ge.s32.totalorder %s14_s14, 4   ;;  %s742_s13 = smov %s744_s15 }
  0x61   :  { %13 = sbr.rel (!%p11_p6) target bundleno = 2 (0x2), region = 77 }

</bundles_post_ra>
